<compile_context>
chip_gen: v7x
topology: tpu7x:2x2x1
jax: 0.10.0
libtpu: 0.0.40
codegen_flags: <defaults>
</compile_context>

<pallas_src>
import jax
import jax.numpy as jnp
from jax.experimental import pallas as pl
from jax.experimental.pallas import tpu as pltpu


def _round_up(n: int, m: int) -> int:
    return ((n + m - 1) // m) * m


def _best_tile(total: int, unit: int, max_tile: int) -> int:
    """Largest tile (multiple of `unit`) that divides `total` and is <= max_tile.

    `total` must already be a multiple of `unit`. Falls back to `unit` (which
    always divides `total`), so every output store stays unmasked/lane-dense
    while padding waste is minimized for awkward B.
    """
    n = total // unit
    cap = max(1, max_tile // unit)
    best = 1
    for d in range(1, min(n, cap) + 1):
        if n % d == 0:
            best = d
    return best * unit


def _vmem_budget_bytes() -> int:
    """Physical VMEM per core (conservative fallback if the query fails)."""
    try:
        info = pltpu.get_tpu_info()
        vmem = getattr(info, "vmem_capacity_bytes", None)
        if vmem:
            return int(vmem)
    except Exception:  # pragma: no cover - query unavailable (e.g. emulator)
        pass
    return 64 * 1024 * 1024  # assume the smallest (v7x-like) VMEM


def _make_mc_kernel(num_item_features: int):
    I = num_item_features

    def kernel(z_ref, item_ref, o_ref):
        # z_ref:    (TB_I, I)     precomputed user @ M row tile
        # item_ref: (I, TB_J)     feature-major item tile (out-tile columns)
        # o_ref:    (TB_I, TB_J)  lane-dense output tile
        z = z_ref[...]
        item = item_ref[...]

        # out = z @ item (contraction over the tiny I axis) as I outer-product
        # broadcast FMAs on the VPU, accumulated in vregs (no o_ref RMW).
        acc = z[:, 0:1] * item[0:1, :]                     # (TB_I, TB_J)
        for k in range(1, I):
            acc = acc + z[:, k:k + 1] * item[k:k + 1, :]

        # sigmoid(x)*5 == 2.5*tanh(0.5*x) + 2.5 : one EUP transcendental per
        # vreg (vs exp + reciprocal), fused into the single full-tile store.
        o_ref[...] = 2.5 * jnp.tanh(0.5 * acc) + 2.5

    return kernel


def matrix_completion_forward(x, M, user_features_size: int):
    """x: (B, U+I) f32, M: (U, I) f32 -> (B, B) f32 = sigmoid(x_u @ M @ x_i.T) * 5."""
    B, F = x.shape
    U = user_features_size
    I = F - U

    # Wrapper-side math/layout plumbing (tiny, fused by XLA):
    #  - z = user @ M, so the kernel is a pure rank-I outer product,
    #  - item presented feature-major so no in-kernel transpose,
    #  - pad rows to a multiple of 8 (sublanes) and columns to a multiple of
    #    128 (lanes) so every output store is unmasked and lane-dense.
    z = x[:, :U] @ M                       # (B, I)
    item_t = x[:, U:].T                    # (I, B)

    Bi_min = _round_up(B, 8)
    Bj_min = _round_up(B, 128)

    # Generation-aware tile budget: the only big resident buffer is the
    # double-buffered output tile, so size it from physical VMEM.
    vmem = _vmem_budget_bytes()
    if vmem >= 100 * 1024 * 1024:          # v5e / v6e (128 MiB VMEM)
        tile_budget = 16 * 1024 * 1024     # f32 output tile bytes
        cap_j, cap_i = 4096, 1024
        vmem_limit = 80 * 1024 * 1024
    else:                                  # v7x-class (64 MiB VMEM)
        tile_budget = 8 * 1024 * 1024
        cap_j, cap_i = 4096, 1024
        vmem_limit = 48 * 1024 * 1024

    # Padding-aware tile selection: tiles divide the rounded extents exactly.
    TB_J = _best_tile(Bj_min, 128, cap_j)
    TB_I = _best_tile(Bi_min, 8, min(cap_i, max(8, tile_budget // (TB_J * 4))))

    Bi = _round_up(B, TB_I)
    Bj = _round_up(B, TB_J)

    z_p = z if Bi == B else jnp.pad(z, ((0, Bi - B), (0, 0)))
    item_p = item_t if Bj == B else jnp.pad(item_t, ((0, 0), (0, Bj - B)))

    grid = (Bi // TB_I, Bj // TB_J)
    kernel = _make_mc_kernel(I)

    out = pl.pallas_call(
        kernel,
        out_shape=jax.ShapeDtypeStruct((Bi, Bj), jnp.float32),
        grid_spec=pltpu.PrefetchScalarGridSpec(
            num_scalar_prefetch=0,
            grid=grid,
            in_specs=[
                pl.BlockSpec((TB_I, I), lambda i, j: (i, 0)),  # z row tile
                pl.BlockSpec((I, TB_J), lambda i, j: (0, j)),  # item col tile
            ],
            out_specs=pl.BlockSpec((TB_I, TB_J), lambda i, j: (i, j)),
        ),
        compiler_params=pltpu.CompilerParams(
            # Independent output tiles: shard across both TensorCores on v7x.
            dimension_semantics=("parallel", "parallel"),
            vmem_limit_bytes=vmem_limit,
        ),
    )(z_p, item_p)

    return out[:B, :B]


if __name__ == "__main__":
    # Small shapes consistent with the module: 2 user features, 2 item features.
    batch = 8
    user_features_size = 2
    item_features_size = 2

    key = jax.random.PRNGKey(0)
    k_m, k_x = jax.random.split(key)

    # nn.Parameter(torch.rand(U, I)) -> uniform [0, 1), deterministic here.
    M = jax.random.uniform(
        k_m, (user_features_size, item_features_size), dtype=jnp.float32
    )
    # Input x = [user_features | item_features] per row.
    x = jax.random.uniform(
        k_x, (batch, user_features_size + item_features_size),
        dtype=jnp.float32, minval=0.0, maxval=1.0,
    )

    out = matrix_completion_forward(x, M, user_features_size)
    out = jax.block_until_ready(out)

    # Pure-JAX reference check (same math as the PyTorch forward).
    u = x[:, :user_features_size]
    v = x[:, user_features_size:]
    ref = jax.nn.sigmoid(u @ M @ v.T) * 5.0
    assert out.shape == (batch, batch)
    assert jnp.allclose(out, ref, atol=1e-5, rtol=1e-5)

    print("KERNEL_OK")
</pallas_src>

<mosaic_0001>
module attributes {stable_mosaic.version = 11 : i64} {
  func.func @kernel(%arg0: i32, %arg1: i32, %arg2: memref<8x2xf32, #tpu.memory_space<vmem>>, %arg3: memref<2x128xf32, #tpu.memory_space<vmem>>, %arg4: memref<8x128xf32, #tpu.memory_space<vmem>>) attributes {dimension_semantics = [#tpu.dimension_semantics<parallel>, #tpu.dimension_semantics<parallel>], iteration_bounds = array<i64: 1, 1>, scalar_prefetch = 0 : i64, scratch_operands = 0 : i64, tpu.core_type = #tpu.core_type<tc>, window_params = [{transform_indices = @transform_0, window_bounds = array<i64: 8, 2>}, {transform_indices = @transform_1, window_bounds = array<i64: 2, 128>}, {transform_indices = @transform_2, window_bounds = array<i64: 8, 128>}]} {
    %c0 = arith.constant 0 : index
    %c0_0 = arith.constant 0 : index
    %0 = vector.load %arg2[%c0, %c0_0] : memref<8x2xf32, #tpu.memory_space<vmem>>, vector<8x2xf32>
    %c0_1 = arith.constant 0 : index
    %c0_2 = arith.constant 0 : index
    %1 = vector.load %arg3[%c0_1, %c0_2] : memref<2x128xf32, #tpu.memory_space<vmem>>, vector<2x128xf32>
    %2 = vector.extract_strided_slice %0 {offsets = [0, 0], sizes = [8, 1], strides = [1, 1]} : vector<8x2xf32> to vector<8x1xf32>
    %3 = vector.extract_strided_slice %1 {offsets = [0, 0], sizes = [1, 128], strides = [1, 1]} : vector<2x128xf32> to vector<1x128xf32>
    %4 = vector.broadcast %2 : vector<8x1xf32> to vector<8x128xf32>
    %5 = vector.broadcast %3 : vector<1x128xf32> to vector<8x128xf32>
    %6 = arith.mulf %4, %5 : vector<8x128xf32>
    %7 = vector.extract_strided_slice %0 {offsets = [0, 1], sizes = [8, 1], strides = [1, 1]} : vector<8x2xf32> to vector<8x1xf32>
    %8 = vector.extract_strided_slice %1 {offsets = [1, 0], sizes = [1, 128], strides = [1, 1]} : vector<2x128xf32> to vector<1x128xf32>
    %9 = vector.broadcast %7 : vector<8x1xf32> to vector<8x128xf32>
    %10 = vector.broadcast %8 : vector<1x128xf32> to vector<8x128xf32>
    %11 = arith.mulf %9, %10 : vector<8x128xf32>
    %12 = arith.addf %6, %11 : vector<8x128xf32>
    %cst = arith.constant 5.000000e-01 : f32
    %13 = vector.broadcast %cst : f32 to vector<8x128xf32>
    %14 = arith.mulf %13, %12 : vector<8x128xf32>
    %15 = math.tanh %14 : vector<8x128xf32>
    %cst_3 = arith.constant 2.500000e+00 : f32
    %16 = vector.broadcast %cst_3 : f32 to vector<8x128xf32>
    %17 = arith.mulf %16, %15 : vector<8x128xf32>
    %cst_4 = arith.constant 2.500000e+00 : f32
    %18 = vector.broadcast %cst_4 : f32 to vector<8x128xf32>
    %19 = arith.addf %17, %18 : vector<8x128xf32>
    %c0_5 = arith.constant 0 : index
    %c0_6 = arith.constant 0 : index
    %20 = vector.load %arg4[%c0_5, %c0_6] : memref<8x128xf32, #tpu.memory_space<vmem>>, vector<8x128xf32>
    tpu.vector_store %arg4[%c0_5, %c0_6], %19 {strides = array<i32>} : memref<8x128xf32, #tpu.memory_space<vmem>>, vector<8x128xf32>,
    return
  }
  func.func @transform_0(%arg0: i32, %arg1: i32) -> (i32, i32) {
    %c0_i32 = arith.constant 0 : i32
    %c0_i32_0 = arith.constant 0 : i32
    return %arg0, %c0_i32 : i32, i32
  }
  func.func @transform_1(%arg0: i32, %arg1: i32) -> (i32, i32) {
    %c0_i32 = arith.constant 0 : i32
    %c0_i32_0 = arith.constant 0 : i32
    return %c0_i32, %arg1 : i32, i32
  }
  func.func @transform_2(%arg0: i32, %arg1: i32) -> (i32, i32) {
    %c0_i32 = arith.constant 0 : i32
    return %arg0, %arg1 : i32, i32
  }
}

</mosaic_0001>

<bundles_post_ra>
// kernel: tpu_custom_call.1
= control target key start
LH: loop header
LB: loop body
LE: loop exit
PB: predicated region body
PF: predicated region fallthrough
CT: control target
= control target key end

     0   :  { %v84_v1 = vmov 0   ;;  %s120_s0 = inlined_call_operand.vmem [shape: f32[8,2], index: 0, kind: input, shape index: {}]   ;;  %s121_s1 = inlined_call_operand.vmem [shape: f32[2,128], index: 1, kind: input, shape index: {}]   ;;  %s122_s2 = inlined_call_operand.hbm [shape: f32[8,128], index: 2, kind: output, shape index: {}]  }
   0x1   :  { %v12_v0 = vld [vmem:[%s120_s0] sm:$0xff]  ;;  %56 = vset.pattern.permute.xlu0 %v84_v1 }
   0x2   :  { %7 = vsyncpa [#allocation3], 0  ;;  %16 = vperm.xlu0 %56, %v12_v0   ;;  %v85_v2 = vmov 1   ;;  %v19_v3 = vlaneseq  ;;  %v13_v7 = vld [vmem:[%s121_s1] sm:$0x3]  ;;  %s86_s0 = smov [#allocation2]  }
   0x3   :  { %s45_s13 = sshll.u32 %s86_s0, 4  ;;  %s46_s13 = int_to_ptr.vmem [resolvable:$true] %s45_s13 }
   0x4   :  { %v20_v4 = vshrl.u32 %v19_v3, 7  ;;  %s60_s14 = scalar_lea.vmem %s46_s13, 128  ;;  %p65_p1 = scmp.lt.s32.totalorder %s46_s13, %s46_s13 }
   0x5   :  { %p61_p0 = scmp.ne.s32.totalorder %s46_s13, %s60_s14  ;;  %p66_p2 = scmp.lt.s32.totalorder %s60_s14, %s60_s14 }
   0x6   :  { %57 = vset.pattern.permute.xlu0 %v85_v2  ;;  %v21_v5 = vsub.s32 0, %v20_v4  ;;  %v30_v6 = vsub.s32 1, %v20_v4 }
   0x7   :  { %25 = vperm.xlu0 %57, %v12_v0   ;;  %p67_p3 = por %p66_p2, %p65_p1 }
   0x8   :  { %v22_v9 = vrot.slane %v13_v7, %v21_v5  ;;  %v31_v10 = vrot.slane %v13_v7, %v30_v6 }
   0x9   :  { %p68_p4 = pnand %p67_p3, %p61_p0 }
  0x81   :  { %v17_v8 = vpop.permute.xlu0 %16 }
  0x82   :  { %v23_v12 = vmul.f32 %v22_v9, %v17_v8 }
  0x86   :  { %v26_v11 = vpop.permute.xlu0 %25 }
  0x87   :  { %v32_v13 = vmul.f32 %v31_v10, %v26_v11 }
  0x89   :  { %v33_v14 = vadd.f32 %v32_v13, %v23_v12 }
  0x8b   :  { %v34_v15 = vmul.f32 0.5, %v33_v14 }
  0x8d   :  { %58 = vtanh.f32 %v34_v15 }
  0x97   :  { %v59_v16 = vpop.eup %58 }
  0x98   :  { %v36_v17 = vmul.f32 2.5, %v59_v16 }
  0x9a   :  { %v37_v18 = vadd.f32 2.5, %v36_v17 }
  0x9c   :  { %38 = vst [vmem:[#allocation2] sm:$0xff] %v37_v18 }
  0x9d   :  { %71 = shalt.err (!%p68_p4)
}
  0x9e   :  { %s72_s16 = scalar_lea.hbm %s122_s2, 128 }
  0x9f   :  { %p73_p5 = scmp.ne.s32.totalorder %s122_s2, %s72_s16  ;;  %p76_p6 = scmp.lt.u32.totalorder %s72_s16, %s122_s2 }
  0xa1   :  { %p78_p7 = pnand %p76_p6, %p73_p5 }
  0xa3   :  { %81 = shalt.err (!%p78_p7)
}
  0xa4   :  { %48 = dma.vmem_to_hbm [thread:$0]  %s46_s13, 128, %s122_s2, [#allocation3]  }
  0xa5   :  { %82 = dma.done.wait [#allocation3], 128  }
  0xa6   :  { %83 = vsyncadd [#allocation3], 4294967168 }
  0xa7   :  { %52 = vsyncpa [#allocation3], 1 }

</bundles_post_ra>
